<compile_context>
chip_gen: v6e
topology: v6e:2x2x1
jax: 0.10.0
libtpu: 0.0.40
codegen_flags: <defaults>
</compile_context>

<pallas_src>
import functools

import jax
import jax.numpy as jnp
from jax.experimental import pallas as pl
from jax.experimental.pallas import tpu as pltpu


def _round_up(x: int, m: int) -> int:
    return ((x + m - 1) // m) * m


def _cdiv(a: int, b: int) -> int:
    return -(-a // b)


def _residual_block_kernel(x_ref, w1_ref, b1_ref, w2_ref, b2_ref, o_ref, *,
                           compute_dtype, precision):
    x = x_ref[...]                                        # (tile_rows, dim), input dtype
    # ReLU is exact in any dtype; cast only the MXU operand.
    h = jnp.maximum(x, 0).astype(compute_dtype)
    h = jnp.dot(h, w1_ref[...], preferred_element_type=jnp.float32,
                precision=precision)
    h = h + b1_ref[...]                                   # f32 bias
    h = jnp.maximum(h, 0.0)                               # relu in f32
    h = jnp.dot(h.astype(compute_dtype), w2_ref[...],
                preferred_element_type=jnp.float32, precision=precision)
    h = h + b2_ref[...]
    # Residual upcast deferred to the final add (no f32 copy of x held live).
    o_ref[...] = (h + x.astype(jnp.float32)).astype(o_ref.dtype)


def prepare_params(w1, b1, w2, b2, compute_dtype=jnp.bfloat16):
    """Cast parameters ONCE at setup time (cache the result; don't redo per call)."""
    compute_dtype = jnp.dtype(compute_dtype)
    return (jnp.asarray(w1, compute_dtype),
            jnp.asarray(b1, jnp.float32).reshape(1, -1),
            jnp.asarray(w2, compute_dtype),
            jnp.asarray(b2, jnp.float32).reshape(1, -1))


def residual_block_1d(x, w1, b1, w2, b2, *, tile_rows=None, out_dtype=None):
    """x: (..., dim) -> (..., dim). w: (dim, dim) used as x @ w (pre-cast to the
    compute dtype, see prepare_params), b: (dim,) or (1, dim) float32."""
    orig_shape = x.shape
    dim = orig_shape[-1]
    rows = 1
    for s in orig_shape[:-1]:
        rows *= s

    compute_dtype = jnp.dtype(w1.dtype)
    out_dtype = jnp.dtype(out_dtype) if out_dtype is not None else jnp.dtype(x.dtype)
    x_it = jnp.dtype(x.dtype).itemsize
    o_it = out_dtype.itemsize
    w_it = compute_dtype.itemsize
    precision = (jax.lax.Precision.HIGHEST
                 if compute_dtype == jnp.float32 else None)

    x2 = x.reshape(rows, dim)                         # metadata-only, no HBM pass
    b1 = jnp.asarray(b1, jnp.float32).reshape(1, dim)
    b2 = jnp.asarray(b2, jnp.float32).reshape(1, dim)

    # ---- generation-aware VMEM cap with headroom ----
    try:
        cap = int(0.85 * pltpu.get_tpu_info().vmem_capacity_bytes)
    except Exception:
        cap = 64 * 1024 * 1024                        # conservative fallback

    # ---- sublane-aligned row tile; even grid for v7x's two TensorCores ----
    sub = max(8, 32 // max(1, x_it))                  # 8 (f32), 16 (bf16), 32 (i8)
    if tile_rows is None:
        target = 1024
        if rows <= target:
            n_tiles = 1                               # don't split tiny problems
        else:
            n_tiles = _cdiv(rows, target)
            if n_tiles % 2:                           # even split across 2 TCs
                n_tiles += 1
        tile_rows = _round_up(_cdiv(rows, n_tiles), sub)
    tile_rows = max(sub, _round_up(int(tile_rows), sub))
    tile_rows = min(tile_rows, _round_up(rows, sub))

    def vmem_needed(tr, resident_bufs):
        return (2 * tr * dim * x_it                   # x tile, double-buffered
                + 2 * tr * dim * o_it                 # out tile, double-buffered
                + resident_bufs * 2 * dim * dim * w_it    # W1 + W2
                + resident_bufs * 2 * dim * 4)        # b1 + b2 (f32)

    # Shrink the row tile if it would not fit under the cap.
    while tile_rows > sub and vmem_needed(tile_rows, 2) > cap:
        tile_rows = max(sub, _round_up(tile_rows // 2, sub))

    grid_m = _cdiv(rows, tile_rows)                   # ragged final tile is masked

    cost = pl.CostEstimate(
        flops=4 * rows * dim * dim,                   # two (rows x dim x dim) matmuls
        transcendentals=0,
        bytes_accessed=(rows * dim * (x_it + o_it)
                        + 2 * dim * dim * w_it + 2 * dim * 4),
    )

    kernel = functools.partial(_residual_block_kernel,
                               compute_dtype=compute_dtype, precision=precision)

    def build(single_buffer_resident):
        if single_buffer_resident:
            def resident(shape):
                return pl.BlockSpec(shape, lambda i: (0, 0),
                                    pipeline_mode=pl.Buffered(1))
            need = vmem_needed(tile_rows, 1)
        else:
            def resident(shape):
                return pl.BlockSpec(shape, lambda i: (0, 0))
            need = vmem_needed(tile_rows, 2)
        # Never set the limit below the actual requirement; leave headroom.
        vmem_limit = min(max(2 * need, 16 * 1024 * 1024), cap)
        vmem_limit = int(max(vmem_limit, need + (2 << 20)))
        return pl.pallas_call(
            kernel,
            out_shape=jax.ShapeDtypeStruct((rows, dim), out_dtype),
            grid_spec=pltpu.PrefetchScalarGridSpec(
                num_scalar_prefetch=0,
                grid=(grid_m,),
                in_specs=[
                    pl.BlockSpec((tile_rows, dim), lambda i: (i, 0)),  # x tile
                    resident((dim, dim)),                              # W1
                    resident((1, dim)),                                # b1
                    resident((dim, dim)),                              # W2
                    resident((1, dim)),                                # b2
                ],
                out_specs=pl.BlockSpec((tile_rows, dim), lambda i: (i, 0)),
            ),
            compiler_params=pltpu.CompilerParams(
                dimension_semantics=("parallel",),
                vmem_limit_bytes=vmem_limit,
            ),
            cost_estimate=cost,
        )

    try:
        out = build(single_buffer_resident=True)(x2, w1, b1, w2, b2)
    except Exception:
        # Fallback for jax versions without BlockSpec(pipeline_mode=pl.Buffered(1)).
        out = build(single_buffer_resident=False)(x2, w1, b1, w2, b2)

    return out.reshape(orig_shape)


def _reference(x, w1, b1, w2, b2):
    h = jnp.maximum(x, 0.0)
    h = jnp.dot(h, w1) + b1
    h = jnp.maximum(h, 0.0)
    h = jnp.dot(h, w2) + b2
    return h + x


if __name__ == "__main__":
    key = jax.random.PRNGKey(0)
    batch, seq, dim = 2, 8, 32  # ResidualBlock1d(dim=32); x: (batch, seq, dim)

    k_x, k_w1, k_b1, k_w2 = jax.random.split(key, 4)
    x = jax.random.normal(k_x, (batch, seq, dim), dtype=jnp.float32)

    # linear_1: init='relu' -> He-scaled normal.
    w1 = jax.random.normal(k_w1, (dim, dim), dtype=jnp.float32) * jnp.sqrt(2.0 / dim)
    b1 = jax.random.normal(k_b1, (dim,), dtype=jnp.float32) * 0.01
    # linear_2: init='final' -> zero in the original; tiny random here so the
    # second matmul path is actually exercised.
    w2 = jax.random.normal(k_w2, (dim, dim), dtype=jnp.float32) * 1e-2
    b2 = jnp.zeros((dim,), dtype=jnp.float32)

    ref = _reference(x, w1, b1, w2, b2)

    # Exact-ish path: f32 weights -> f32 MXU compute (Precision.HIGHEST).
    p32 = prepare_params(w1, b1, w2, b2, compute_dtype=jnp.float32)
    out_f32 = jax.block_until_ready(residual_block_1d(x, *p32))
    assert out_f32.shape == x.shape and out_f32.dtype == x.dtype
    assert jnp.allclose(out_f32, ref, atol=1e-3, rtol=1e-3), "f32 mismatch vs reference"

    # Bandwidth-optimized default: bf16 matmul operands, f32 accumulation,
    # residual added at the input (f32) precision.
    pbf = prepare_params(w1, b1, w2, b2, compute_dtype=jnp.bfloat16)
    out_bf16 = jax.block_until_ready(residual_block_1d(x, *pbf))
    assert out_bf16.shape == x.shape and out_bf16.dtype == x.dtype
    assert jnp.allclose(out_bf16, ref, atol=3e-2, rtol=3e-2), "bf16 mismatch vs reference"

    print("KERNEL_OK")
</pallas_src>

<mosaic_0001>
module attributes {stable_mosaic.version = 11 : i64} {
  func.func @_residual_block_kernel(%arg0: i32, %arg1: memref<16x32xf32, #tpu.memory_space<vmem>>, %arg2: memref<32x32xf32, #tpu.memory_space<vmem>>, %arg3: memref<1x32xf32, #tpu.memory_space<vmem>>, %arg4: memref<32x32xf32, #tpu.memory_space<vmem>>, %arg5: memref<1x32xf32, #tpu.memory_space<vmem>>, %arg6: memref<16x32xf32, #tpu.memory_space<vmem>>) attributes {dimension_semantics = [#tpu.dimension_semantics<parallel>], iteration_bounds = array<i64: 1>, scalar_prefetch = 0 : i64, scratch_operands = 0 : i64, tpu.core_type = #tpu.core_type<tc>, window_params = [{transform_indices = @transform_0, window_bounds = array<i64: 16, 32>}, {pipeline_mode = #tpu.pipeline_mode<synchronous>, transform_indices = @transform_1, window_bounds = array<i64: 32, 32>}, {pipeline_mode = #tpu.pipeline_mode<synchronous>, transform_indices = @transform_2, window_bounds = array<i64: 1, 32>}, {pipeline_mode = #tpu.pipeline_mode<synchronous>, transform_indices = @transform_3, window_bounds = array<i64: 32, 32>}, {pipeline_mode = #tpu.pipeline_mode<synchronous>, transform_indices = @transform_4, window_bounds = array<i64: 1, 32>}, {transform_indices = @transform_5, window_bounds = array<i64: 16, 32>}]} {
    %c0 = arith.constant 0 : index
    %c0_0 = arith.constant 0 : index
    %0 = vector.load %arg1[%c0, %c0_0] : memref<16x32xf32, #tpu.memory_space<vmem>>, vector<16x32xf32>
    %cst = arith.constant 0.000000e+00 : f32
    %1 = vector.broadcast %cst : f32 to vector<16x32xf32>
    %2 = arith.maximumf %0, %1 : vector<16x32xf32>
    %c0_1 = arith.constant 0 : index
    %c0_2 = arith.constant 0 : index
    %3 = vector.load %arg2[%c0_1, %c0_2] : memref<32x32xf32, #tpu.memory_space<vmem>>, vector<32x32xf32>
    %cst_3 = arith.constant dense<0.000000e+00> : vector<16x32xf32>
    %4 = tpu.matmul %2, %3, %cst_3 {dimension_numbers = #tpu.dot_dimension_numbers<[1], [0], [0], [1], [0, 0, 1, 1], [], []>, precision = #tpu.contract_precision<fp32>} : vector<16x32xf32>, vector<32x32xf32>, vector<16x32xf32> -> vector<16x32xf32>
    %c0_4 = arith.constant 0 : index
    %c0_5 = arith.constant 0 : index
    %5 = vector.load %arg3[%c0_4, %c0_5] : memref<1x32xf32, #tpu.memory_space<vmem>>, vector<1x32xf32>
    %6 = vector.broadcast %5 : vector<1x32xf32> to vector<16x32xf32>
    %7 = arith.addf %4, %6 : vector<16x32xf32>
    %cst_6 = arith.constant 0.000000e+00 : f32
    %8 = vector.broadcast %cst_6 : f32 to vector<16x32xf32>
    %9 = arith.maximumf %7, %8 : vector<16x32xf32>
    %c0_7 = arith.constant 0 : index
    %c0_8 = arith.constant 0 : index
    %10 = vector.load %arg4[%c0_7, %c0_8] : memref<32x32xf32, #tpu.memory_space<vmem>>, vector<32x32xf32>
    %cst_9 = arith.constant dense<0.000000e+00> : vector<16x32xf32>
    %11 = tpu.matmul %9, %10, %cst_9 {dimension_numbers = #tpu.dot_dimension_numbers<[1], [0], [0], [1], [0, 0, 1, 1], [], []>, precision = #tpu.contract_precision<fp32>} : vector<16x32xf32>, vector<32x32xf32>, vector<16x32xf32> -> vector<16x32xf32>
    %c0_10 = arith.constant 0 : index
    %c0_11 = arith.constant 0 : index
    %12 = vector.load %arg5[%c0_10, %c0_11] : memref<1x32xf32, #tpu.memory_space<vmem>>, vector<1x32xf32>
    %13 = vector.broadcast %12 : vector<1x32xf32> to vector<16x32xf32>
    %14 = arith.addf %11, %13 : vector<16x32xf32>
    %15 = arith.addf %14, %0 : vector<16x32xf32>
    %c0_12 = arith.constant 0 : index
    %c0_13 = arith.constant 0 : index
    %16 = vector.load %arg6[%c0_12, %c0_13] : memref<16x32xf32, #tpu.memory_space<vmem>>, vector<16x32xf32>
    tpu.vector_store %arg6[%c0_12, %c0_13], %15 {strides = array<i32>} : memref<16x32xf32, #tpu.memory_space<vmem>>, vector<16x32xf32>,
    return
  }
  func.func @transform_0(%arg0: i32) -> (i32, i32) {
    %c0_i32 = arith.constant 0 : i32
    %c0_i32_0 = arith.constant 0 : i32
    return %arg0, %c0_i32 : i32, i32
  }
  func.func @transform_1(%arg0: i32) -> (i32, i32) {
    %c0_i32 = arith.constant 0 : i32
    %c0_i32_0 = arith.constant 0 : i32
    %c0_i32_1 = arith.constant 0 : i32
    return %c0_i32, %c0_i32_0 : i32, i32
  }
  func.func @transform_2(%arg0: i32) -> (i32, i32) {
    %c0_i32 = arith.constant 0 : i32
    %c0_i32_0 = arith.constant 0 : i32
    %c0_i32_1 = arith.constant 0 : i32
    return %c0_i32, %c0_i32_0 : i32, i32
  }
  func.func @transform_3(%arg0: i32) -> (i32, i32) {
    %c0_i32 = arith.constant 0 : i32
    %c0_i32_0 = arith.constant 0 : i32
    %c0_i32_1 = arith.constant 0 : i32
    return %c0_i32, %c0_i32_0 : i32, i32
  }
  func.func @transform_4(%arg0: i32) -> (i32, i32) {
    %c0_i32 = arith.constant 0 : i32
    %c0_i32_0 = arith.constant 0 : i32
    %c0_i32_1 = arith.constant 0 : i32
    return %c0_i32, %c0_i32_0 : i32, i32
  }
  func.func @transform_5(%arg0: i32) -> (i32, i32) {
    %c0_i32 = arith.constant 0 : i32
    %c0_i32_0 = arith.constant 0 : i32
    return %arg0, %c0_i32 : i32, i32
  }
}

module attributes {stable_mosaic.version = 11 : i64} {
  func.func @_residual_block_kernel(%arg0: i32, %arg1: memref<16x32xf32, #tpu.memory_space<vmem>>, %arg2: memref<32x32xf32, #tpu.memory_space<vmem>>, %arg3: memref<1x32xf32, #tpu.memory_space<vmem>>, %arg4: memref<32x32xf32, #tpu.memory_space<vmem>>, %arg5: memref<1x32xf32, #tpu.memory_space<vmem>>, %arg6: memref<16x32xf32, #tpu.memory_space<vmem>>) attributes {dimension_semantics = [#tpu.dimension_semantics<parallel>], iteration_bounds = array<i64: 1>, scalar_prefetch = 0 : i64, scratch_operands = 0 : i64, tpu.core_type = #tpu.core_type<tc>, window_params = [{transform_indices = @transform_0, window_bounds = array<i64: 16, 32>}, {pipeline_mode = #tpu.pipeline_mode<synchronous>, transform_indices = @transform_1, window_bounds = array<i64: 32, 32>}, {pipeline_mode = #tpu.pipeline_mode<synchronous>, transform_indices = @transform_2, window_bounds = array<i64: 1, 32>}, {pipeline_mode = #tpu.pipeline_mode<synchronous>, transform_indices = @transform_3, window_bounds = array<i64: 32, 32>}, {pipeline_mode = #tpu.pipeline_mode<synchronous>, transform_indices = @transform_4, window_bounds = array<i64: 1, 32>}, {transform_indices = @transform_5, window_bounds = array<i64: 16, 32>}]} {
    %c0 = arith.constant 0 : index
    %c0_0 = arith.constant 0 : index
    %0 = vector.load %arg1[%c0, %c0_0] : memref<16x32xf32, #tpu.memory_space<vmem>>, vector<16x32xf32>
    %cst = arith.constant 0.000000e+00 : f32
    %1 = vector.broadcast %cst : f32 to vector<16x32xf32>
    %2 = arith.maximumf %0, %1 : vector<16x32xf32>
    %c0_1 = arith.constant 0 : index
    %c0_2 = arith.constant 0 : index
    %3 = vector.load %arg2[%c0_1, %c0_2] : memref<32x32xf32, #tpu.memory_space<vmem>>, vector<32x32xf32>
    %cst_3 = arith.constant dense<0.000000e+00> : vector<16x32xf32>
    %4 = tpu.matmul %2, %3, %cst_3 {dimension_numbers = #tpu.dot_dimension_numbers<[1], [0], [0], [1], [0, 0, 1, 1], [], []>, precision = #tpu.contract_precision<fp32>} : vector<16x32xf32>, vector<32x32xf32>, vector<16x32xf32> -> vector<16x32xf32>
    %c0_4 = arith.constant 0 : index
    %c0_5 = arith.constant 0 : index
    %5 = vector.load %arg3[%c0_4, %c0_5] : memref<1x32xf32, #tpu.memory_space<vmem>>, vector<1x32xf32>
    %6 = vector.broadcast %5 : vector<1x32xf32> to vector<16x32xf32>
    %7 = arith.addf %4, %6 : vector<16x32xf32>
    %cst_6 = arith.constant 0.000000e+00 : f32
    %8 = vector.broadcast %cst_6 : f32 to vector<16x32xf32>
    %9 = arith.maximumf %7, %8 : vector<16x32xf32>
    %c0_7 = arith.constant 0 : index
    %c0_8 = arith.constant 0 : index
    %10 = vector.load %arg4[%c0_7, %c0_8] : memref<32x32xf32, #tpu.memory_space<vmem>>, vector<32x32xf32>
    %cst_9 = arith.constant dense<0.000000e+00> : vector<16x32xf32>
    %11 = tpu.matmul %9, %10, %cst_9 {dimension_numbers = #tpu.dot_dimension_numbers<[1], [0], [0], [1], [0, 0, 1, 1], [], []>, precision = #tpu.contract_precision<fp32>} : vector<16x32xf32>, vector<32x32xf32>, vector<16x32xf32> -> vector<16x32xf32>
    %c0_10 = arith.constant 0 : index
    %c0_11 = arith.constant 0 : index
    %12 = vector.load %arg5[%c0_10, %c0_11] : memref<1x32xf32, #tpu.memory_space<vmem>>, vector<1x32xf32>
    %13 = vector.broadcast %12 : vector<1x32xf32> to vector<16x32xf32>
    %14 = arith.addf %11, %13 : vector<16x32xf32>
    %15 = arith.addf %14, %0 : vector<16x32xf32>
    %c0_12 = arith.constant 0 : index
    %c0_13 = arith.constant 0 : index
    %16 = vector.load %arg6[%c0_12, %c0_13] : memref<16x32xf32, #tpu.memory_space<vmem>>, vector<16x32xf32>
    tpu.vector_store %arg6[%c0_12, %c0_13], %15 {strides = array<i32>} : memref<16x32xf32, #tpu.memory_space<vmem>>, vector<16x32xf32>,
    return
  }
  func.func @transform_0(%arg0: i32) -> (i32, i32) {
    %c0_i32 = arith.constant 0 : i32
    %c0_i32_0 = arith.constant 0 : i32
    return %arg0, %c0_i32 : i32, i32
  }
  func.func @transform_1(%arg0: i32) -> (i32, i32) {
    %c0_i32 = arith.constant 0 : i32
    %c0_i32_0 = arith.constant 0 : i32
    %c0_i32_1 = arith.constant 0 : i32
    return %c0_i32, %c0_i32_0 : i32, i32
  }
  func.func @transform_2(%arg0: i32) -> (i32, i32) {
    %c0_i32 = arith.constant 0 : i32
    %c0_i32_0 = arith.constant 0 : i32
    %c0_i32_1 = arith.constant 0 : i32
    return %c0_i32, %c0_i32_0 : i32, i32
  }
  func.func @transform_3(%arg0: i32) -> (i32, i32) {
    %c0_i32 = arith.constant 0 : i32
    %c0_i32_0 = arith.constant 0 : i32
    %c0_i32_1 = arith.constant 0 : i32
    return %c0_i32, %c0_i32_0 : i32, i32
  }
  func.func @transform_4(%arg0: i32) -> (i32, i32) {
    %c0_i32 = arith.constant 0 : i32
    %c0_i32_0 = arith.constant 0 : i32
    %c0_i32_1 = arith.constant 0 : i32
    return %c0_i32, %c0_i32_0 : i32, i32
  }
  func.func @transform_5(%arg0: i32) -> (i32, i32) {
    %c0_i32 = arith.constant 0 : i32
    %c0_i32_0 = arith.constant 0 : i32
    return %arg0, %c0_i32 : i32, i32
  }
}

</mosaic_0001>

<bundles_post_ra>
// kernel: tpu_custom_call.1
= control target key start
LH: loop header
LB: loop body
LE: loop exit
PB: predicated region body
PF: predicated region fallthrough
CT: control target
= control target key end

     0   :  { %10 = vsyncpa [#allocation3], 0  ;;  %s1687_s0 = inlined_call_operand.hbm [shape: f32[16,32], index: 0, kind: input, shape index: {}]   ;;  %s1688_s1 = inlined_call_operand.hbm [shape: f32[32,32], index: 1, kind: input, shape index: {}]   ;;  %s1689_s2 = inlined_call_operand.vmem [shape: f32[1,32], index: 2, kind: input, shape index: {}]   ;;  %s1690_s3 = inlined_call_operand.hbm [shape: f32[32,32], index: 3, kind: input, shape index: {}]   ;;  %s1691_s4 = inlined_call_operand.vmem [shape: f32[1,32], index: 4, kind: input, shape index: {}]   ;;  %s1692_s5 = inlined_call_operand.hbm [shape: f32[16,32], index: 5, kind: output, shape index: {}]  }
   0x1   :  { %11 = vsyncpa [#allocation6], 0 }
   0x2   :  { %12 = vsyncpa [#allocation4], 0  ;;  %s1479_s18 = smov [#allocation5]   ;;  %s1480_s20 = smov [#allocation2]  }
   0x3   :  { %s30_s19 = sshll.u32 %s1479_s18, 4  ;;  %s18_s21 = sshll.u32 %s1480_s20, 4  ;;  %s31_s19 = int_to_ptr.vmem [resolvable:$true] %s30_s19  ;;  %s19_s21 = int_to_ptr.vmem [resolvable:$true] %s18_s21 }
   0x4   :  { %s1401_s22 = scalar_lea.vmem %s31_s19, 512  ;;  %p1406_p1 = scmp.lt.s32.totalorder %s31_s19, %s31_s19 }
   0x5   :  { %p1402_p0 = scmp.ne.s32.totalorder %s31_s19, %s1401_s22  ;;  %p1407_p2 = scmp.lt.s32.totalorder %s1401_s22, %s1401_s22 }
   0x7   :  { %p1408_p3 = por %p1407_p2, %p1406_p1 }
   0x9   :  { %p1409_p4 = pnand %p1408_p3, %p1402_p0 }
   0xb   :  { %1412 = shalt.err (!%p1409_p4)
}
   0xc   :  { %s1481_s23 = smov 128   ;;  %s1482_s24 = smov 8  }
   0xd   :  { %36 = dma.hbm_to_vmem [thread:$0]  %s1688_s1, 512, %s31_s19, [#allocation6], %s1481_s23, %s1481_s23, %s1482_s24  }
   0xe   :  { %s1421_s27 = scalar_lea.vmem %s19_s21, 256  ;;  %p1426_p6 = scmp.lt.s32.totalorder %s19_s21, %s19_s21 }
   0xf   :  { %p1422_p5 = scmp.ne.s32.totalorder %s19_s21, %s1421_s27  ;;  %p1427_p7 = scmp.lt.s32.totalorder %s1421_s27, %s1421_s27 }
  0x11   :  { %p1428_p8 = por %p1427_p7, %p1426_p6 }
  0x13   :  { %p1429_p9 = pnand %p1428_p8, %p1422_p5 }
  0x15   :  { %1432 = shalt.err (!%p1429_p9)
}
  0x16   :  { %24 = dma.hbm_to_vmem [thread:$0]  %s1687_s0, 256, %s19_s21, [#allocation3], %s1481_s23, %s1481_s23, %s1482_s24  }
  0x17   :  { %s1483_s30 = smov [#allocation7]  }
  0x18   :  { %s44_s6 = sshll.u32 %s1483_s30, 4  ;;  %s45_s6 = int_to_ptr.vmem [resolvable:$true] %s44_s6 }
  0x19   :  { %s1441_s7 = scalar_lea.vmem %s45_s6, 512  ;;  %p1446_p11 = scmp.lt.s32.totalorder %s45_s6, %s45_s6 }
  0x1a   :  { %p1442_p10 = scmp.ne.s32.totalorder %s45_s6, %s1441_s7  ;;  %p1447_p12 = scmp.lt.s32.totalorder %s1441_s7, %s1441_s7 }
  0x1c   :  { %p1448_p13 = por %p1447_p12, %p1446_p11 }
  0x1e   :  { %p1449_p0 = pnand %p1448_p13, %p1442_p10 }
  0x20   :  { %1452 = shalt.err (!%p1449_p0)
}
  0x21   :  { %50 = dma.hbm_to_vmem [thread:$0]  %s1690_s3, 512, %s45_s6, [#allocation6], %s1481_s23, %s1481_s23, %s1482_s24  }
  0x22   :  { %1473 = dma.done.wait [#allocation3], 256  }
  0x23   :  { %1474 = vsyncadd [#allocation3], 4294967040 }
  0x24   :  { %1475 = dma.done.wait [#allocation6], 1024  }
  0x25   :  { %1476 = vsyncadd [#allocation6], 4294966272  ;;  %v69_v0 = vld [vmem:[#allocation5 + $0x18] sm:$0xff]  ;;  %v68_v1 = vld [vmem:[#allocation5 + $0x10] sm:$0xff]  ;;  %vm77_vm0 = vcmask 261120  }
  0x26   :  { %v67_v2 = vld [vmem:[#allocation5 + $0x8] sm:$0xff]  ;;  %v1533_v3 = vand.u32 4294901760, %v69_v0  ;;  %v1535_v4 = vand.u32 4294901760, %v68_v1  ;;  %v66_v6 = vld [vmem:[#allocation5] sm:$0xff]  ;;  %v1539_v7 = vld [vmem:[#allocation2] sm:$0xff] }
  0x27   :  { %v1537_v5 = vand.u32 4294901760, %v67_v2  ;;  %v1541_v8 = vld [vmem:[#allocation2 + $0x8] sm:$0xff]  ;;  %v1543_v9 = vand.u32 4294901760, %v66_v6  ;;  %v64_v10 = vmax.f32 %v1539_v7, 0.0  ;;  %v616_v42 = vld [vmem:[#allocation7 + $0x10] sm:$0xff]  ;;  %v615_v45 = vld [vmem:[#allocation7 + $0x8] sm:$0xff] }
  0x28   :  { %v65_v11 = vmax.f32 %v1541_v8, 0.0  ;;  %1255 = vmatprep.subr.mxu0 %v1533_v3  ;;  %v199_v12 = vsub.f32 %v69_v0, %v1533_v3  ;;  %v206_v13 = vsub.f32 %v68_v1, %v1535_v4  ;;  %v617_v40 = vld [vmem:[#allocation7 + $0x18] sm:$0xff]  ;;  %v1594_v44 = vand.u32 4294901760, %v616_v42  ;;  %v614_v49 = vld [vmem:[#allocation7] sm:$0xff]  ;;  %v1181_v1 = vld [vmem:[%s1689_s2] ss:$0 sm:$0xff] }
  0x29   :  { %v213_v14 = vsub.f32 %v67_v2, %v1537_v5  ;;  %1256 = vmatpush3.msra.mxu0 %v1533_v3  ;;  %v79_v15 = vsel %vm77_vm0, %v64_v10, 0  ;;  %v220_v17 = vsub.f32 %v66_v6, %v1543_v9  ;;  %v1589_v41 = vand.u32 4294901760, %v617_v40 }
  0x2a   :  { %v82_v16 = vsel %vm77_vm0, %v65_v11, 0  ;;  %1257 = vmatprep.subr.mxu0 %v1535_v4  ;;  %v200_v18 = vand.u32 4294901760, %v199_v12  ;;  %v207_v19 = vand.u32 4294901760, %v206_v13  ;;  %v1556_v20 = vand.u32 4294901760, %v79_v15 }
  0x2b   :  { %v1558_v21 = vand.u32 4294901760, %v82_v16  ;;  %1258 = vmatpush3.msra.mxu0 %v1535_v4  ;;  %v214_v22 = vand.u32 4294901760, %v213_v14  ;;  %v221_v23 = vand.u32 4294901760, %v220_v17  ;;  %v1592_v43 = vsub.f32 %v617_v40, %v1589_v41 }
  0x2c   :  { %1259 = vmatprep.subr.mxu0 %v1537_v5  ;;  %v201_v24 = vsub.f32 %v199_v12, %v200_v18  ;;  %v208_v25 = vsub.f32 %v206_v13, %v207_v19  ;;  %v154_v26 = vsub.f32 %v79_v15, %v1556_v20  ;;  %1274 = vmatprep.mubr.f32.mxu1 %v1556_v20  ;;  %v1604_v48 = vand.u32 4294901760, %v615_v45 }
  0x2d   :  { %v164_v27 = vsub.f32 %v82_v16, %v1558_v21  ;;  %1260 = vmatpush3.msra.mxu0 %v1537_v5  ;;  %v215_v28 = vsub.f32 %v213_v14, %v214_v22  ;;  %v222_v29 = vsub.f32 %v220_v17, %v221_v23  ;;  %v1599_v46 = vand.u32 4294901760, %v1592_v43 }
  0x2e   :  { %v202_v30 = vand.u32 4294901760, %v201_v24  ;;  %1261 = vmatprep.subr.mxu0 %v1543_v9  ;;  %v209_v31 = vand.u32 4294901760, %v208_v25  ;;  %v155_v32 = vand.u32 4294901760, %v154_v26  ;;  %v1602_v47 = vsub.f32 %v616_v42, %v1594_v44  ;;  %v1182_v42 = vld [vmem:[%s1691_s4] ss:$0 sm:$0xff]  ;;  %s1484_s4 = smov [#allocation8]  }
  0x2f   :  { %v165_v33 = vand.u32 4294901760, %v164_v27  ;;  %1262 = vmatpush3.msra.mxu0 %v1543_v9  ;;  %v216_v36 = vand.u32 4294901760, %v215_v28  ;;  %v223_v39 = vand.u32 4294901760, %v222_v29  ;;  %v748_v50 = vsub.f32 %v1592_v43, %v1599_v46  ;;  %s1168_s10 = sshll.u32 %s1484_s4, 4  ;;  %s1169_s10 = int_to_ptr.vmem [resolvable:$true] %s1168_s10 }
  0x30   :  { %1266 = vmatprep.subr.mxu1 %v202_v30  ;;  %v156_v34 = vsub.f32 %v154_v26, %v155_v32  ;;  %1277 = vmatprep.subr.mxu0 %v199_v12  ;;  %v1611_v51 = vand.u32 4294901760, %v1602_v47  ;;  %v1614_v52 = vsub.f32 %v615_v45, %v1604_v48  ;;  %v1616_v53 = vand.u32 4294901760, %v614_v49  ;;  %s1453_s11 = scalar_lea.vmem %s1169_s10, 256  ;;  %p1458_p2 = scmp.lt.s32.totalorder %s1169_s10, %s1169_s10 }
  0x31   :  { %v166_v35 = vsub.f32 %v164_v27, %v165_v33  ;;  %1267 = vmatpush3.msra.mxu1 %v202_v30  ;;  %v749_v54 = vand.u32 4294901760, %v748_v50  ;;  %p1454_p1 = scmp.ne.s32.totalorder %s1169_s10, %s1453_s11  ;;  %p1459_p3 = scmp.lt.s32.totalorder %s1453_s11, %s1453_s11 }
  0x32   :  { %1268 = vmatprep.subr.mxu1 %v209_v31  ;;  %v157_v37 = vand.u32 4294901760, %v156_v34  ;;  %v755_v55 = vsub.f32 %v1602_v47, %v1611_v51  ;;  %v1623_v56 = vand.u32 4294901760, %v1614_v52  ;;  %v1626_v57 = vsub.f32 %v614_v49, %v1616_v53 }
  0x33   :  { %v167_v38 = vand.u32 4294901760, %v166_v35  ;;  %1269 = vmatpush3.msra.mxu1 %v209_v31  ;;  %p1460_p4 = por %p1459_p3, %p1458_p2 }
  0x34   :  { %1263 = vmatprep.mubr.f32.mxu0 %v157_v37  ;;  %1270 = vmatprep.subr.mxu1 %v216_v36  ;;  %v756_v58 = vand.u32 4294901760, %v755_v55  ;;  %v762_v59 = vsub.f32 %v1614_v52, %v1623_v56  ;;  %v1633_v60 = vand.u32 4294901760, %v1626_v57 }
  0x35   :  { %1264 = vmatmul.mubr.f32.vlgmr.msra.gmra.mxu0 %v167_v38  ;;  %1271 = vmatpush3.msra.mxu1 %v216_v36  ;;  %p1461_p5 = pnand %p1460_p4, %p1454_p1 }
  0x36   :  { %1278 = vmatpush3.msra.mxu0 %v199_v12  ;;  %1272 = vmatprep.subr.mxu1 %v223_v39  ;;  %v763_v61 = vand.u32 4294901760, %v762_v59  ;;  %v769_v62 = vsub.f32 %v1626_v57, %v1633_v60 }
  0x37   :  { %1279 = vmatprep.subr.mxu0 %v206_v13  ;;  %1273 = vmatpush3.msra.mxu1 %v223_v39 }
  0x38   :  { %1280 = vmatpush3.msra.mxu0 %v206_v13  ;;  %1275 = vmatmul.mubr.f32.vlgmr.msra.gmra.mxu1 %v1558_v21  ;;  %v770_v63 = vand.u32 4294901760, %v769_v62 }
  0x39   :  { %1281 = vmatprep.subr.mxu0 %v213_v14  ;;  %1288 = vmatprep.subr.mxu1 %v1533_v3 }
  0x3a   :  { %1282 = vmatpush3.msra.mxu0 %v213_v14  ;;  %1289 = vmatpush3.msra.mxu1 %v1533_v3 }
  0x3b   :  { %1283 = vmatprep.subr.mxu0 %v220_v17  ;;  %1285 = vmatprep.mubr.f32.mxu0 %v154_v26 }
  0x3c   :  { %1284 = vmatpush3.msra.mxu0 %v220_v17  ;;  %1290 = vmatprep.subr.mxu1 %v1535_v4 }
  0x3d   :  { %1286 = vmatmul.mubr.f32.vlgmr.msra.gmra.mxu0 %v164_v27  ;;  %1291 = vmatpush3.msra.mxu1 %v1535_v4 }
  0x3e   :  { %1299 = vmatprep.subr.mxu0 %v200_v18  ;;  %1292 = vmatprep.subr.mxu1 %v1537_v5 }
  0x3f   :  { %1300 = vmatpush3.msra.mxu0 %v200_v18  ;;  %1293 = vmatpush3.msra.mxu1 %v1537_v5 }
  0x40   :  { %1301 = vmatprep.subr.mxu0 %v207_v19  ;;  %1294 = vmatprep.subr.mxu1 %v1543_v9 }
  0x41   :  { %1302 = vmatpush3.msra.mxu0 %v207_v19  ;;  %1295 = vmatpush3.msra.mxu1 %v1543_v9 }
  0x42   :  { %1296 = vmatprep.mubr.f32.mxu1 %v155_v32  ;;  %1303 = vmatprep.subr.mxu0 %v214_v22 }
  0x43   :  { %1297 = vmatmul.mubr.f32.vlgmr.msra.gmra.mxu1 %v165_v33  ;;  %1304 = vmatpush3.msra.mxu0 %v214_v22 }
  0x44   :  { %1310 = vmatprep.subr.mxu1 %v1533_v3  ;;  %1305 = vmatprep.subr.mxu0 %v221_v23 }
  0x45   :  { %1311 = vmatpush3.msra.mxu1 %v1533_v3  ;;  %1306 = vmatpush3.msra.mxu0 %v221_v23 }
  0x46   :  { %1307 = vmatprep.mubr.f32.mxu0 %v1556_v20  ;;  %1312 = vmatprep.subr.mxu1 %v1535_v4 }
  0x47   :  { %1308 = vmatmul.mubr.f32.vlgmr.msra.gmra.mxu0 %v1558_v21  ;;  %1313 = vmatpush3.msra.mxu1 %v1535_v4 }
  0x48   :  { %1314 = vmatprep.subr.mxu1 %v1537_v5  ;;  %1318 = vmatprep.mubr.f32.mxu1 %v1556_v20 }
  0x49   :  { %1315 = vmatpush3.msra.mxu1 %v1537_v5  ;;  %1321 = vmatprep.subr.mxu0 %v1589_v41 }
  0x4a   :  { %1316 = vmatprep.subr.mxu1 %v1543_v9  ;;  %1322 = vmatpush3.msra.mxu0 %v1589_v41 }
  0x4b   :  { %1317 = vmatpush3.msra.mxu1 %v1543_v9  ;;  %1323 = vmatprep.subr.mxu0 %v1594_v44 }
  0x4c   :  { %1319 = vmatmul.mubr.f32.vlgmr.msra.gmra.mxu1 %v1558_v21  ;;  %1324 = vmatpush3.msra.mxu0 %v1594_v44 }
  0x4d   :  { %1325 = vmatprep.subr.mxu0 %v1604_v48  ;;  %1332 = vmatprep.subr.mxu1 %v749_v54 }
  0x4e   :  { %1326 = vmatpush3.msra.mxu0 %v1604_v48  ;;  %1333 = vmatpush3.msra.mxu1 %v749_v54 }
  0x4f   :  { %1327 = vmatprep.subr.mxu0 %v1616_v53  ;;  %1334 = vmatprep.subr.mxu1 %v756_v58 }
  0x50   :  { %1328 = vmatpush3.msra.mxu0 %v1616_v53  ;;  %1335 = vmatpush3.msra.mxu1 %v756_v58 }
  0x51   :  { %1343 = vmatprep.subr.mxu0 %v1592_v43  ;;  %1336 = vmatprep.subr.mxu1 %v763_v61 }
  0x52   :  { %1337 = vmatpush3.msra.mxu1 %v763_v61 }
  0x53   :  { %1338 = vmatprep.subr.mxu1 %v770_v63 }
  0x54   :  { %1339 = vmatpush3.msra.mxu1 %v770_v63 }
  0x55   :  { %1354 = vmatprep.subr.mxu1 %v1589_v41 }
  0xf5   :  { %v1265_v0 = vpop.f32.mrf.mxu0 }
  0xf6   :  { %v170_v4 = vadd.f32 %v1265_v0, %v1181_v1 }
  0xf7   :  { %v159_v2 = vpop.f32.mrf.mxu0 }
  0xf8   :  { %v1276_v3 = vpop.f32.mrf.mxu1  ;;  %v160_v5 = vadd.f32 %v1181_v1, %v159_v2 }
  0xf9   :  { %v267_v10 = vadd.f32 %v1276_v3, %v170_v4 }
  0xfa   :  { %v260_v6 = vpop.f32.mrf.mxu1 }
  0xfb   :  { %v261_v11 = vadd.f32 %v260_v6, %v160_v5 }
  0xfd   :  { %v1287_v9 = vpop.f32.mrf.mxu0 }
  0xfe   :  { %v354_v14 = vadd.f32 %v1287_v9, %v267_v10 }
  0xff   :  { %v346_v13 = vpop.f32.mrf.mxu0 }
 0x100   :  { %v347_v16 = vadd.f32 %v346_v13, %v261_v11 }
 0x103   :  { %v1298_v12 = vpop.f32.mrf.mxu1 }
 0x104   :  { %v439_v17 = vadd.f32 %v1298_v12, %v354_v14 }
 0x105   :  { %v430_v15 = vpop.f32.mrf.mxu1 }
 0x106   :  { %v431_v19 = vadd.f32 %v430_v15, %v347_v16 }
 0x107   :  { %v1309_v18 = vpop.f32.mrf.mxu0 }
 0x108   :  { %v528_v21 = vadd.f32 %v1309_v18, %v439_v17 }
 0x109   :  { %v521_v20 = vpop.f32.mrf.mxu0 }
 0x10a   :  { %v522_v23 = vadd.f32 %v521_v20, %v431_v19 }
 0x10c   :  { %v1320_v22 = vpop.f32.mrf.mxu1 }
 0x10d   :  { %v609_v24 = vadd.f32 %v1320_v22, %v528_v21 }
 0x10e   :  { %v602_v25 = vpop.f32.mrf.mxu1 }
 0x10f   :  { %v613_v26 = vmax.f32 %v609_v24, 0.0  ;;  %v603_v27 = vadd.f32 %v602_v25, %v522_v23 }
 0x111   :  { %v629_v28 = vsel %vm77_vm0, %v613_v26, 0  ;;  %v612_v29 = vmax.f32 %v603_v27, 0.0 }
 0x112   :  { %v710_v30 = vand.u32 4294901760, %v629_v28 }
 0x113   :  { %v626_v31 = vsel %vm77_vm0, %v612_v29, 0 }
 0x114   :  { %v711_v32 = vsub.f32 %v629_v28, %v710_v30  ;;  %v700_v33 = vand.u32 4294901760, %v626_v31 }
 0x116   :  { %v701_v34 = vsub.f32 %v626_v31, %v700_v33  ;;  %1340 = vmatprep.mubr.f32.mxu1 %v700_v33  ;;  %v712_v35 = vand.u32 4294901760, %v711_v32 }
 0x117   :  { %1341 = vmatmul.mubr.f32.vlgmr.msra.gmra.mxu1 %v710_v30 }
 0x118   :  { %1355 = vmatpush3.msra.mxu1 %v1589_v41  ;;  %v702_v36 = vand.u32 4294901760, %v701_v34  ;;  %v713_v38 = vsub.f32 %v711_v32, %v712_v35 }
 0x119   :  { %1356 = vmatprep.subr.mxu1 %v1594_v44 }
 0x11a   :  { %1357 = vmatpush3.msra.mxu1 %v1594_v44  ;;  %1362 = vmatprep.mubr.f32.mxu1 %v702_v36  ;;  %v703_v37 = vsub.f32 %v701_v34, %v702_v36  ;;  %v714_v40 = vand.u32 4294901760, %v713_v38 }
 0x11b   :  { %1358 = vmatprep.subr.mxu1 %v1604_v48 }
 0x11c   :  { %1359 = vmatpush3.msra.mxu1 %v1604_v48  ;;  %v704_v39 = vand.u32 4294901760, %v703_v37 }
 0x11d   :  { %1360 = vmatprep.subr.mxu1 %v1616_v53 }
 0x11e   :  { %1361 = vmatpush3.msra.mxu1 %v1616_v53  ;;  %1329 = vmatprep.mubr.f32.mxu0 %v704_v39 }
 0x11f   :  { %1363 = vmatmul.mubr.f32.vlgmr.msra.gmra.mxu1 %v712_v35  ;;  %1376 = vmatprep.subr.mxu1 %v1589_v41 }
 0x120   :  { %1330 = vmatmul.mubr.f32.vlgmr.msra.gmra.mxu0 %v714_v40  ;;  %1377 = vmatpush3.msra.mxu1 %v1589_v41 }
 0x121   :  { %1344 = vmatpush3.msra.mxu0 %v1592_v43  ;;  %1384 = vmatprep.mubr.f32.mxu1 %v700_v33 }
 0x122   :  { %1345 = vmatprep.subr.mxu0 %v1602_v47  ;;  %1351 = vmatprep.mubr.f32.mxu0 %v701_v34 }
 0x123   :  { %1378 = vmatprep.subr.mxu1 %v1594_v44  ;;  %1346 = vmatpush3.msra.mxu0 %v1602_v47 }
 0x124   :  { %1379 = vmatpush3.msra.mxu1 %v1594_v44  ;;  %1347 = vmatprep.subr.mxu0 %v1614_v52 }
 0x125   :  { %1380 = vmatprep.subr.mxu1 %v1604_v48  ;;  %1348 = vmatpush3.msra.mxu0 %v1614_v52 }
 0x126   :  { %1381 = vmatpush3.msra.mxu1 %v1604_v48  ;;  %1349 = vmatprep.subr.mxu0 %v1626_v57 }
 0x127   :  { %1382 = vmatprep.subr.mxu1 %v1616_v53  ;;  %1350 = vmatpush3.msra.mxu0 %v1626_v57 }
 0x128   :  { %1383 = vmatpush3.msra.mxu1 %v1616_v53  ;;  %1352 = vmatmul.mubr.f32.vlgmr.msra.gmra.mxu0 %v711_v32 }
 0x129   :  { %1365 = vmatprep.subr.mxu0 %v1599_v46  ;;  %1385 = vmatmul.mubr.f32.vlgmr.msra.gmra.mxu1 %v710_v30 }
 0x12a   :  { %1366 = vmatpush3.msra.mxu0 %v1599_v46  ;;  %1373 = vmatprep.mubr.f32.mxu0 %v700_v33 }
 0x12b   :  { %1367 = vmatprep.subr.mxu0 %v1611_v51 }
 0x12c   :  { %1368 = vmatpush3.msra.mxu0 %v1611_v51 }
 0x12d   :  { %1369 = vmatprep.subr.mxu0 %v1623_v56 }
 0x12e   :  { %1370 = vmatpush3.msra.mxu0 %v1623_v56 }
 0x12f   :  { %1371 = vmatprep.subr.mxu0 %v1633_v60 }
 0x130   :  { %1372 = vmatpush3.msra.mxu0 %v1633_v60 }
 0x131   :  { %1374 = vmatmul.mubr.f32.vlgmr.msra.gmra.mxu0 %v710_v30 }
 0x1d7   :  { %v1342_v43 = vpop.f32.mrf.mxu1 }
 0x1d9   :  { %v807_v48 = vpop.f32.mrf.mxu1 }
 0x1df   :  { %v1364_v50 = vpop.f32.mrf.mxu1 }
 0x1e0   :  { %v1331_v41 = vpop.f32.mrf.mxu0 }
 0x1e1   :  { %v717_v45 = vadd.f32 %v1331_v41, %v1182_v42  ;;  %v977_v55 = vpop.f32.mrf.mxu1 }
 0x1e2   :  { %v706_v44 = vpop.f32.mrf.mxu0 }
 0x1e3   :  { %v707_v46 = vadd.f32 %v1182_v42, %v706_v44  ;;  %v814_v49 = vadd.f32 %v1342_v43, %v717_v45 }
 0x1e5   :  { %v808_v53 = vadd.f32 %v807_v48, %v707_v46 }
 0x1e8   :  { %v1353_v47 = vpop.f32.mrf.mxu0 }
 0x1e9   :  { %v901_v52 = vadd.f32 %v1353_v47, %v814_v49  ;;  %v1386_v57 = vpop.f32.mrf.mxu1 }
 0x1ea   :  { %v893_v51 = vpop.f32.mrf.mxu0 }
 0x1eb   :  { %v894_v54 = vadd.f32 %v893_v51, %v808_v53  ;;  %v986_v56 = vadd.f32 %v1364_v50, %v901_v52  ;;  %v1149_v0 = vpop.f32.mrf.mxu1 }
 0x1ed   :  { %v978_v60 = vadd.f32 %v977_v55, %v894_v54 }
 0x1f1   :  { %v1375_v58 = vpop.f32.mrf.mxu0 }
 0x1f2   :  { %v1075_v59 = vadd.f32 %v1375_v58, %v986_v56 }
 0x1f3   :  { %v1068_v61 = vpop.f32.mrf.mxu0 }
 0x1f4   :  { %v1156_v62 = vadd.f32 %v1386_v57, %v1075_v59  ;;  %v1069_v63 = vadd.f32 %v1068_v61, %v978_v60 }
 0x1f6   :  { %v1160_v1 = vadd.f32 %v1156_v62, %v1541_v8  ;;  %v1150_v2 = vadd.f32 %v1149_v0, %v1069_v63 }
 0x1f8   :  { %1162 = vst.msk [vmem:[#allocation8 + $0x8] sm:$0xff] %vm77_vm0, %v1160_v1  ;;  %v1159_v3 = vadd.f32 %v1150_v2, %v1539_v7 }
 0x1fa   :  { %1161 = vst.msk [vmem:[#allocation8] sm:$0xff] %vm77_vm0, %v1159_v3 }
 0x1fb   :  { %1464 = shalt.err (!%p1461_p5)
}
 0x1fc   :  { %1174 = dma.vmem_to_hbm [thread:$0]  %s1169_s10, 256, %s1692_s5, [#allocation4], %s1481_s23, %s1481_s23, %s1482_s24  }
 0x1fd   :  { %1477 = dma.done.wait [#allocation4], 256  }
 0x1fe   :  { %1478 = vsyncadd [#allocation4], 4294967040 }
 0x1ff   :  { %1178 = vsyncpa [#allocation3], 1 }
 0x200   :  { %1179 = vsyncpa [#allocation6], 1 }
 0x201   :  { %1180 = vsyncpa [#allocation4], 1 }

// kernel: tpu_custom_call.1
= control target key start
LH: loop header
LB: loop body
LE: loop exit
PB: predicated region body
PF: predicated region fallthrough
CT: control target
= control target key end

     0   :  { %10 = vsyncpa [#allocation3], 0  ;;  %s1687_s0 = inlined_call_operand.hbm [shape: f32[16,32], index: 0, kind: input, shape index: {}]   ;;  %s1688_s1 = inlined_call_operand.hbm [shape: f32[32,32], index: 1, kind: input, shape index: {}]   ;;  %s1689_s2 = inlined_call_operand.vmem [shape: f32[1,32], index: 2, kind: input, shape index: {}]   ;;  %s1690_s3 = inlined_call_operand.hbm [shape: f32[32,32], index: 3, kind: input, shape index: {}]   ;;  %s1691_s4 = inlined_call_operand.vmem [shape: f32[1,32], index: 4, kind: input, shape index: {}]   ;;  %s1692_s5 = inlined_call_operand.hbm [shape: f32[16,32], index: 5, kind: output, shape index: {}]  }
   0x1   :  { %11 = vsyncpa [#allocation6], 0 }
   0x2   :  { %12 = vsyncpa [#allocation4], 0  ;;  %s1479_s18 = smov [#allocation5]   ;;  %s1480_s20 = smov [#allocation2]  }
   0x3   :  { %s30_s19 = sshll.u32 %s1479_s18, 4  ;;  %s18_s21 = sshll.u32 %s1480_s20, 4  ;;  %s31_s19 = int_to_ptr.vmem [resolvable:$true] %s30_s19  ;;  %s19_s21 = int_to_ptr.vmem [resolvable:$true] %s18_s21 }
   0x4   :  { %s1401_s22 = scalar_lea.vmem %s31_s19, 512  ;;  %p1406_p1 = scmp.lt.s32.totalorder %s31_s19, %s31_s19 }
   0x5   :  { %p1402_p0 = scmp.ne.s32.totalorder %s31_s19, %s1401_s22  ;;  %p1407_p2 = scmp.lt.s32.totalorder %s1401_s22, %s1401_s22 }
   0x7   :  { %p1408_p3 = por %p1407_p2, %p1406_p1 }
   0x9   :  { %p1409_p4 = pnand %p1408_p3, %p1402_p0 }
   0xb   :  { %1412 = shalt.err (!%p1409_p4)
}
   0xc   :  { %s1481_s23 = smov 128   ;;  %s1482_s24 = smov 8  }
   0xd   :  { %36 = dma.hbm_to_vmem [thread:$0]  %s1688_s1, 512, %s31_s19, [#allocation6], %s1481_s23, %s1481_s23, %s1482_s24  }
   0xe   :  { %s1421_s27 = scalar_lea.vmem %s19_s21, 256  ;;  %p1426_p6 = scmp.lt.s32.totalorder %s19_s21, %s19_s21 }
   0xf   :  { %p1422_p5 = scmp.ne.s32.totalorder %s19_s21, %s1421_s27  ;;  %p1427_p7 = scmp.lt.s32.totalorder %s1421_s27, %s1421_s27 }
  0x11   :  { %p1428_p8 = por %p1427_p7, %p1426_p6 }
  0x13   :  { %p1429_p9 = pnand %p1428_p8, %p1422_p5 }
  0x15   :  { %1432 = shalt.err (!%p1429_p9)
}
  0x16   :  { %24 = dma.hbm_to_vmem [thread:$0]  %s1687_s0, 256, %s19_s21, [#allocation3], %s1481_s23, %s1481_s23, %s1482_s24  }
  0x17   :  { %s1483_s30 = smov [#allocation7]  }
  0x18   :  { %s44_s6 = sshll.u32 %s1483_s30, 4  ;;  %s45_s6 = int_to_ptr.vmem [resolvable:$true] %s44_s6 }
  0x19   :  { %s1441_s7 = scalar_lea.vmem %s45_s6, 512  ;;  %p1446_p11 = scmp.lt.s32.totalorder %s45_s6, %s45_s6 }
  0x1a   :  { %p1442_p10 = scmp.ne.s32.totalorder %s45_s6, %s1441_s7  ;;  %p1447_p12 = scmp.lt.s32.totalorder %s1441_s7, %s1441_s7 }
  0x1c   :  { %p1448_p13 = por %p1447_p12, %p1446_p11 }
  0x1e   :  { %p1449_p0 = pnand %p1448_p13, %p1442_p10 }
  0x20   :  { %1452 = shalt.err (!%p1449_p0)
}
  0x21   :  { %50 = dma.hbm_to_vmem [thread:$0]  %s1690_s3, 512, %s45_s6, [#allocation6], %s1481_s23, %s1481_s23, %s1482_s24  }
  0x22   :  { %1473 = dma.done.wait [#allocation3], 256  }
  0x23   :  { %1474 = vsyncadd [#allocation3], 4294967040 }
  0x24   :  { %1475 = dma.done.wait [#allocation6], 1024  }
  0x25   :  { %1476 = vsyncadd [#allocation6], 4294966272  ;;  %v69_v0 = vld [vmem:[#allocation5 + $0x18] sm:$0xff]  ;;  %v68_v1 = vld [vmem:[#allocation5 + $0x10] sm:$0xff]  ;;  %vm77_vm0 = vcmask 261120  }
  0x26   :  { %v67_v2 = vld [vmem:[#allocation5 + $0x8] sm:$0xff]  ;;  %v1533_v3 = vand.u32 4294901760, %v69_v0  ;;  %v1535_v4 = vand.u32 4294901760, %v68_v1  ;;  %v66_v6 = vld [vmem:[#allocation5] sm:$0xff]  ;;  %v1539_v7 = vld [vmem:[#allocation2] sm:$0xff] }
  0x27   :  { %v1537_v5 = vand.u32 4294901760, %v67_v2  ;;  %v1541_v8 = vld [vmem:[#allocation2 + $0x8] sm:$0xff]  ;;  %v1543_v9 = vand.u32 4294901760, %v66_v6  ;;  %v64_v10 = vmax.f32 %v1539_v7, 0.0  ;;  %v616_v42 = vld [vmem:[#allocation7 + $0x10] sm:$0xff]  ;;  %v615_v45 = vld [vmem:[#allocation7 + $0x8] sm:$0xff] }
  0x28   :  { %v65_v11 = vmax.f32 %v1541_v8, 0.0  ;;  %1255 = vmatprep.subr.mxu0 %v1533_v3  ;;  %v199_v12 = vsub.f32 %v69_v0, %v1533_v3  ;;  %v206_v13 = vsub.f32 %v68_v1, %v1535_v4  ;;  %v617_v40 = vld [vmem:[#allocation7 + $0x18] sm:$0xff]  ;;  %v1594_v44 = vand.u32 4294901760, %v616_v42  ;;  %v614_v49 = vld [vmem:[#allocation7] sm:$0xff]  ;;  %v1181_v1 = vld [vmem:[%s1689_s2] ss:$0 sm:$0xff] }
  0x29   :  { %v213_v14 = vsub.f32 %v67_v2, %v1537_v5  ;;  %1256 = vmatpush3.msra.mxu0 %v1533_v3  ;;  %v79_v15 = vsel %vm77_vm0, %v64_v10, 0  ;;  %v220_v17 = vsub.f32 %v66_v6, %v1543_v9  ;;  %v1589_v41 = vand.u32 4294901760, %v617_v40 }
  0x2a   :  { %v82_v16 = vsel %vm77_vm0, %v65_v11, 0  ;;  %1257 = vmatprep.subr.mxu0 %v1535_v4  ;;  %v200_v18 = vand.u32 4294901760, %v199_v12  ;;  %v207_v19 = vand.u32 4294901760, %v206_v13  ;;  %v1556_v20 = vand.u32 4294901760, %v79_v15 }
  0x2b   :  { %v1558_v21 = vand.u32 4294901760, %v82_v16  ;;  %1258 = vmatpush3.msra.mxu0 %v1535_v4  ;;  %v214_v22 = vand.u32 4294901760, %v213_v14  ;;  %v221_v23 = vand.u32 4294901760, %v220_v17  ;;  %v1592_v43 = vsub.f32 %v617_v40, %v1589_v41 }
  0x2c   :  { %1259 = vmatprep.subr.mxu0 %v1537_v5  ;;  %v201_v24 = vsub.f32 %v199_v12, %v200_v18  ;;  %v208_v25 = vsub.f32 %v206_v13, %v207_v19  ;;  %v154_v26 = vsub.f32 %v79_v15, %v1556_v20  ;;  %1274 = vmatprep.mubr.f32.mxu1 %v1556_v20  ;;  %v1604_v48 = vand.u32 4294901760, %v615_v45 }
  0x2d   :  { %v164_v27 = vsub.f32 %v82_v16, %v1558_v21  ;;  %1260 = vmatpush3.msra.mxu0 %v1537_v5  ;;  %v215_v28 = vsub.f32 %v213_v14, %v214_v22  ;;  %v222_v29 = vsub.f32 %v220_v17, %v221_v23  ;;  %v1599_v46 = vand.u32 4294901760, %v1592_v43 }
  0x2e   :  { %v202_v30 = vand.u32 4294901760, %v201_v24  ;;  %1261 = vmatprep.subr.mxu0 %v1543_v9  ;;  %v209_v31 = vand.u32 4294901760, %v208_v25  ;;  %v155_v32 = vand.u32 4294901760, %v154_v26  ;;  %v1602_v47 = vsub.f32 %v616_v42, %v1594_v44  ;;  %v1182_v42 = vld [vmem:[%s1691_s4] ss:$0 sm:$0xff]  ;;  %s1484_s4 = smov [#allocation8]  }
  0x2f   :  { %v165_v33 = vand.u32 4294901760, %v164_v27  ;;  %1262 = vmatpush3.msra.mxu0 %v1543_v9  ;;  %v216_v36 = vand.u32 4294901760, %v215_v28  ;;  %v223_v39 = vand.u32 4294901760, %v222_v29  ;;  %v748_v50 = vsub.f32 %v1592_v43, %v1599_v46  ;;  %s1168_s10 = sshll.u32 %s1484_s4, 4  ;;  %s1169_s10 = int_to_ptr.vmem [resolvable:$true] %s1168_s10 }
  0x30   :  { %1266 = vmatprep.subr.mxu1 %v202_v30  ;;  %v156_v34 = vsub.f32 %v154_v26, %v155_v32  ;;  %1277 = vmatprep.subr.mxu0 %v199_v12  ;;  %v1611_v51 = vand.u32 4294901760, %v1602_v47  ;;  %v1614_v52 = vsub.f32 %v615_v45, %v1604_v48  ;;  %v1616_v53 = vand.u32 4294901760, %v614_v49  ;;  %s1453_s11 = scalar_lea.vmem %s1169_s10, 256  ;;  %p1458_p2 = scmp.lt.s32.totalorder %s1169_s10, %s1169_s10 }
  0x31   :  { %v166_v35 = vsub.f32 %v164_v27, %v165_v33  ;;  %1267 = vmatpush3.msra.mxu1 %v202_v30  ;;  %v749_v54 = vand.u32 4294901760, %v748_v50  ;;  %p1454_p1 = scmp.ne.s32.totalorder %s1169_s10, %s1453_s11  ;;  %p1459_p3 = scmp.lt.s32.totalorder %s1453_s11, %s1453_s11 }
  0x32   :  { %1268 = vmatprep.subr.mxu1 %v209_v31  ;;  %v157_v37 = vand.u32 4294901760, %v156_v34  ;;  %v755_v55 = vsub.f32 %v1602_v47, %v1611_v51  ;;  %v1623_v56 = vand.u32 4294901760, %v1614_v52  ;;  %v1626_v57 = vsub.f32 %v614_v49, %v1616_v53 }
  0x33   :  { %v167_v38 = vand.u32 4294901760, %v166_v35  ;;  %1269 = vmatpush3.msra.mxu1 %v209_v31  ;;  %p1460_p4 = por %p1459_p3, %p1458_p2 }
  0x34   :  { %1263 = vmatprep.mubr.f32.mxu0 %v157_v37  ;;  %1270 = vmatprep.subr.mxu1 %v216_v36  ;;  %v756_v58 = vand.u32 4294901760, %v755_v55  ;;  %v762_v59 = vsub.f32 %v1614_v52, %v1623_v56  ;;  %v1633_v60 = vand.u32 4294901760, %v1626_v57 }
  0x35   :  { %1264 = vmatmul.mubr.f32.vlgmr.msra.gmra.mxu0 %v167_v38  ;;  %1271 = vmatpush3.msra.mxu1 %v216_v36  ;;  %p1461_p5 = pnand %p1460_p4, %p1454_p1 }
  0x36   :  { %1278 = vmatpush3.msra.mxu0 %v199_v12  ;;  %1272 = vmatprep.subr.mxu1 %v223_v39  ;;  %v763_v61 = vand.u32 4294901760, %v762_v59  ;;  %v769_v62 = vsub.f32 %v1626_v57, %v1633_v60 }
  0x37   :  { %1279 = vmatprep.subr.mxu0 %v206_v13  ;;  %1273 = vmatpush3.msra.mxu1 %v223_v39 }
  0x38   :  { %1280 = vmatpush3.msra.mxu0 %v206_v13  ;;  %1275 = vmatmul.mubr.f32.vlgmr.msra.gmra.mxu1 %v1558_v21  ;;  %v770_v63 = vand.u32 4294901760, %v769_v62 }
  0x39   :  { %1281 = vmatprep.subr.mxu0 %v213_v14  ;;  %1288 = vmatprep.subr.mxu1 %v1533_v3 }
  0x3a   :  { %1282 = vmatpush3.msra.mxu0 %v213_v14  ;;  %1289 = vmatpush3.msra.mxu1 %v1533_v3 }
  0x3b   :  { %1283 = vmatprep.subr.mxu0 %v220_v17  ;;  %1285 = vmatprep.mubr.f32.mxu0 %v154_v26 }
  0x3c   :  { %1284 = vmatpush3.msra.mxu0 %v220_v17  ;;  %1290 = vmatprep.subr.mxu1 %v1535_v4 }
  0x3d   :  { %1286 = vmatmul.mubr.f32.vlgmr.msra.gmra.mxu0 %v164_v27  ;;  %1291 = vmatpush3.msra.mxu1 %v1535_v4 }
  0x3e   :  { %1299 = vmatprep.subr.mxu0 %v200_v18  ;;  %1292 = vmatprep.subr.mxu1 %v1537_v5 }
  0x3f   :  { %1300 = vmatpush3.msra.mxu0 %v200_v18  ;;  %1293 = vmatpush3.msra.mxu1 %v1537_v5 }
  0x40   :  { %1301 = vmatprep.subr.mxu0 %v207_v19  ;;  %1294 = vmatprep.subr.mxu1 %v1543_v9 }
  0x41   :  { %1302 = vmatpush3.msra.mxu0 %v207_v19  ;;  %1295 = vmatpush3.msra.mxu1 %v1543_v9 }
  0x42   :  { %1296 = vmatprep.mubr.f32.mxu1 %v155_v32  ;;  %1303 = vmatprep.subr.mxu0 %v214_v22 }
  0x43   :  { %1297 = vmatmul.mubr.f32.vlgmr.msra.gmra.mxu1 %v165_v33  ;;  %1304 = vmatpush3.msra.mxu0 %v214_v22 }
  0x44   :  { %1310 = vmatprep.subr.mxu1 %v1533_v3  ;;  %1305 = vmatprep.subr.mxu0 %v221_v23 }
  0x45   :  { %1311 = vmatpush3.msra.mxu1 %v1533_v3  ;;  %1306 = vmatpush3.msra.mxu0 %v221_v23 }
  0x46   :  { %1307 = vmatprep.mubr.f32.mxu0 %v1556_v20  ;;  %1312 = vmatprep.subr.mxu1 %v1535_v4 }
  0x47   :  { %1308 = vmatmul.mubr.f32.vlgmr.msra.gmra.mxu0 %v1558_v21  ;;  %1313 = vmatpush3.msra.mxu1 %v1535_v4 }
  0x48   :  { %1314 = vmatprep.subr.mxu1 %v1537_v5  ;;  %1318 = vmatprep.mubr.f32.mxu1 %v1556_v20 }
  0x49   :  { %1315 = vmatpush3.msra.mxu1 %v1537_v5  ;;  %1321 = vmatprep.subr.mxu0 %v1589_v41 }
  0x4a   :  { %1316 = vmatprep.subr.mxu1 %v1543_v9  ;;  %1322 = vmatpush3.msra.mxu0 %v1589_v41 }
  0x4b   :  { %1317 = vmatpush3.msra.mxu1 %v1543_v9  ;;  %1323 = vmatprep.subr.mxu0 %v1594_v44 }
  0x4c   :  { %1319 = vmatmul.mubr.f32.vlgmr.msra.gmra.mxu1 %v1558_v21  ;;  %1324 = vmatpush3.msra.mxu0 %v1594_v44 }
  0x4d   :  { %1325 = vmatprep.subr.mxu0 %v1604_v48  ;;  %1332 = vmatprep.subr.mxu1 %v749_v54 }
  0x4e   :  { %1326 = vmatpush3.msra.mxu0 %v1604_v48  ;;  %1333 = vmatpush3.msra.mxu1 %v749_v54 }
  0x4f   :  { %1327 = vmatprep.subr.mxu0 %v1616_v53  ;;  %1334 = vmatprep.subr.mxu1 %v756_v58 }
  0x50   :  { %1328 = vmatpush3.msra.mxu0 %v1616_v53  ;;  %1335 = vmatpush3.msra.mxu1 %v756_v58 }
  0x51   :  { %1343 = vmatprep.subr.mxu0 %v1592_v43  ;;  %1336 = vmatprep.subr.mxu1 %v763_v61 }
  0x52   :  { %1337 = vmatpush3.msra.mxu1 %v763_v61 }
  0x53   :  { %1338 = vmatprep.subr.mxu1 %v770_v63 }
  0x54   :  { %1339 = vmatpush3.msra.mxu1 %v770_v63 }
  0x55   :  { %1354 = vmatprep.subr.mxu1 %v1589_v41 }
  0xf5   :  { %v1265_v0 = vpop.f32.mrf.mxu0 }
  0xf6   :  { %v170_v4 = vadd.f32 %v1265_v0, %v1181_v1 }
  0xf7   :  { %v159_v2 = vpop.f32.mrf.mxu0 }
  0xf8   :  { %v1276_v3 = vpop.f32.mrf.mxu1  ;;  %v160_v5 = vadd.f32 %v1181_v1, %v159_v2 }
  0xf9   :  { %v267_v10 = vadd.f32 %v1276_v3, %v170_v4 }
  0xfa   :  { %v260_v6 = vpop.f32.mrf.mxu1 }
  0xfb   :  { %v261_v11 = vadd.f32 %v260_v6, %v160_v5 }
  0xfd   :  { %v1287_v9 = vpop.f32.mrf.mxu0 }
  0xfe   :  { %v354_v14 = vadd.f32 %v1287_v9, %v267_v10 }
  0xff   :  { %v346_v13 = vpop.f32.mrf.mxu0 }
 0x100   :  { %v347_v16 = vadd.f32 %v346_v13, %v261_v11 }
 0x103   :  { %v1298_v12 = vpop.f32.mrf.mxu1 }
 0x104   :  { %v439_v17 = vadd.f32 %v1298_v12, %v354_v14 }
 0x105   :  { %v430_v15 = vpop.f32.mrf.mxu1 }
 0x106   :  { %v431_v19 = vadd.f32 %v430_v15, %v347_v16 }
 0x107   :  { %v1309_v18 = vpop.f32.mrf.mxu0 }
 0x108   :  { %v528_v21 = vadd.f32 %v1309_v18, %v439_v17 }
 0x109   :  { %v521_v20 = vpop.f32.mrf.mxu0 }
 0x10a   :  { %v522_v23 = vadd.f32 %v521_v20, %v431_v19 }
 0x10c   :  { %v1320_v22 = vpop.f32.mrf.mxu1 }
 0x10d   :  { %v609_v24 = vadd.f32 %v1320_v22, %v528_v21 }
 0x10e   :  { %v602_v25 = vpop.f32.mrf.mxu1 }
 0x10f   :  { %v613_v26 = vmax.f32 %v609_v24, 0.0  ;;  %v603_v27 = vadd.f32 %v602_v25, %v522_v23 }
 0x111   :  { %v629_v28 = vsel %vm77_vm0, %v613_v26, 0  ;;  %v612_v29 = vmax.f32 %v603_v27, 0.0 }
 0x112   :  { %v710_v30 = vand.u32 4294901760, %v629_v28 }
 0x113   :  { %v626_v31 = vsel %vm77_vm0, %v612_v29, 0 }
 0x114   :  { %v711_v32 = vsub.f32 %v629_v28, %v710_v30  ;;  %v700_v33 = vand.u32 4294901760, %v626_v31 }
 0x116   :  { %v701_v34 = vsub.f32 %v626_v31, %v700_v33  ;;  %1340 = vmatprep.mubr.f32.mxu1 %v700_v33  ;;  %v712_v35 = vand.u32 4294901760, %v711_v32 }
 0x117   :  { %1341 = vmatmul.mubr.f32.vlgmr.msra.gmra.mxu1 %v710_v30 }
 0x118   :  { %1355 = vmatpush3.msra.mxu1 %v1589_v41  ;;  %v702_v36 = vand.u32 4294901760, %v701_v34  ;;  %v713_v38 = vsub.f32 %v711_v32, %v712_v35 }
 0x119   :  { %1356 = vmatprep.subr.mxu1 %v1594_v44 }
 0x11a   :  { %1357 = vmatpush3.msra.mxu1 %v1594_v44  ;;  %1362 = vmatprep.mubr.f32.mxu1 %v702_v36  ;;  %v703_v37 = vsub.f32 %v701_v34, %v702_v36  ;;  %v714_v40 = vand.u32 4294901760, %v713_v38 }
 0x11b   :  { %1358 = vmatprep.subr.mxu1 %v1604_v48 }
 0x11c   :  { %1359 = vmatpush3.msra.mxu1 %v1604_v48  ;;  %v704_v39 = vand.u32 4294901760, %v703_v37 }
 0x11d   :  { %1360 = vmatprep.subr.mxu1 %v1616_v53 }
 0x11e   :  { %1361 = vmatpush3.msra.mxu1 %v1616_v53  ;;  %1329 = vmatprep.mubr.f32.mxu0 %v704_v39 }
 0x11f   :  { %1363 = vmatmul.mubr.f32.vlgmr.msra.gmra.mxu1 %v712_v35  ;;  %1376 = vmatprep.subr.mxu1 %v1589_v41 }
 0x120   :  { %1330 = vmatmul.mubr.f32.vlgmr.msra.gmra.mxu0 %v714_v40  ;;  %1377 = vmatpush3.msra.mxu1 %v1589_v41 }
 0x121   :  { %1344 = vmatpush3.msra.mxu0 %v1592_v43  ;;  %1384 = vmatprep.mubr.f32.mxu1 %v700_v33 }
 0x122   :  { %1345 = vmatprep.subr.mxu0 %v1602_v47  ;;  %1351 = vmatprep.mubr.f32.mxu0 %v701_v34 }
 0x123   :  { %1378 = vmatprep.subr.mxu1 %v1594_v44  ;;  %1346 = vmatpush3.msra.mxu0 %v1602_v47 }
 0x124   :  { %1379 = vmatpush3.msra.mxu1 %v1594_v44  ;;  %1347 = vmatprep.subr.mxu0 %v1614_v52 }
 0x125   :  { %1380 = vmatprep.subr.mxu1 %v1604_v48  ;;  %1348 = vmatpush3.msra.mxu0 %v1614_v52 }
 0x126   :  { %1381 = vmatpush3.msra.mxu1 %v1604_v48  ;;  %1349 = vmatprep.subr.mxu0 %v1626_v57 }
 0x127   :  { %1382 = vmatprep.subr.mxu1 %v1616_v53  ;;  %1350 = vmatpush3.msra.mxu0 %v1626_v57 }
 0x128   :  { %1383 = vmatpush3.msra.mxu1 %v1616_v53  ;;  %1352 = vmatmul.mubr.f32.vlgmr.msra.gmra.mxu0 %v711_v32 }
 0x129   :  { %1365 = vmatprep.subr.mxu0 %v1599_v46  ;;  %1385 = vmatmul.mubr.f32.vlgmr.msra.gmra.mxu1 %v710_v30 }
 0x12a   :  { %1366 = vmatpush3.msra.mxu0 %v1599_v46  ;;  %1373 = vmatprep.mubr.f32.mxu0 %v700_v33 }
 0x12b   :  { %1367 = vmatprep.subr.mxu0 %v1611_v51 }
 0x12c   :  { %1368 = vmatpush3.msra.mxu0 %v1611_v51 }
 0x12d   :  { %1369 = vmatprep.subr.mxu0 %v1623_v56 }
 0x12e   :  { %1370 = vmatpush3.msra.mxu0 %v1623_v56 }
 0x12f   :  { %1371 = vmatprep.subr.mxu0 %v1633_v60 }
 0x130   :  { %1372 = vmatpush3.msra.mxu0 %v1633_v60 }
 0x131   :  { %1374 = vmatmul.mubr.f32.vlgmr.msra.gmra.mxu0 %v710_v30 }
 0x1d7   :  { %v1342_v43 = vpop.f32.mrf.mxu1 }
 0x1d9   :  { %v807_v48 = vpop.f32.mrf.mxu1 }
 0x1df   :  { %v1364_v50 = vpop.f32.mrf.mxu1 }
 0x1e0   :  { %v1331_v41 = vpop.f32.mrf.mxu0 }
 0x1e1   :  { %v717_v45 = vadd.f32 %v1331_v41, %v1182_v42  ;;  %v977_v55 = vpop.f32.mrf.mxu1 }
 0x1e2   :  { %v706_v44 = vpop.f32.mrf.mxu0 }
 0x1e3   :  { %v707_v46 = vadd.f32 %v1182_v42, %v706_v44  ;;  %v814_v49 = vadd.f32 %v1342_v43, %v717_v45 }
 0x1e5   :  { %v808_v53 = vadd.f32 %v807_v48, %v707_v46 }
 0x1e8   :  { %v1353_v47 = vpop.f32.mrf.mxu0 }
 0x1e9   :  { %v901_v52 = vadd.f32 %v1353_v47, %v814_v49  ;;  %v1386_v57 = vpop.f32.mrf.mxu1 }
 0x1ea   :  { %v893_v51 = vpop.f32.mrf.mxu0 }
 0x1eb   :  { %v894_v54 = vadd.f32 %v893_v51, %v808_v53  ;;  %v986_v56 = vadd.f32 %v1364_v50, %v901_v52  ;;  %v1149_v0 = vpop.f32.mrf.mxu1 }
 0x1ed   :  { %v978_v60 = vadd.f32 %v977_v55, %v894_v54 }
 0x1f1   :  { %v1375_v58 = vpop.f32.mrf.mxu0 }
 0x1f2   :  { %v1075_v59 = vadd.f32 %v1375_v58, %v986_v56 }
 0x1f3   :  { %v1068_v61 = vpop.f32.mrf.mxu0 }
 0x1f4   :  { %v1156_v62 = vadd.f32 %v1386_v57, %v1075_v59  ;;  %v1069_v63 = vadd.f32 %v1068_v61, %v978_v60 }
 0x1f6   :  { %v1160_v1 = vadd.f32 %v1156_v62, %v1541_v8  ;;  %v1150_v2 = vadd.f32 %v1149_v0, %v1069_v63 }
 0x1f8   :  { %1162 = vst.msk [vmem:[#allocation8 + $0x8] sm:$0xff] %vm77_vm0, %v1160_v1  ;;  %v1159_v3 = vadd.f32 %v1150_v2, %v1539_v7 }
 0x1fa   :  { %1161 = vst.msk [vmem:[#allocation8] sm:$0xff] %vm77_vm0, %v1159_v3 }
 0x1fb   :  { %1464 = shalt.err (!%p1461_p5)
}
 0x1fc   :  { %1174 = dma.vmem_to_hbm [thread:$0]  %s1169_s10, 256, %s1692_s5, [#allocation4], %s1481_s23, %s1481_s23, %s1482_s24  }
 0x1fd   :  { %1477 = dma.done.wait [#allocation4], 256  }
 0x1fe   :  { %1478 = vsyncadd [#allocation4], 4294967040 }
 0x1ff   :  { %1178 = vsyncpa [#allocation3], 1 }
 0x200   :  { %1179 = vsyncpa [#allocation6], 1 }
 0x201   :  { %1180 = vsyncpa [#allocation4], 1 }

</bundles_post_ra>
